<compile_context>
chip_gen: v7x
topology: tpu7x:2x2x1
jax: 0.10.0
libtpu: 0.0.40
codegen_flags: <defaults>
</compile_context>

<pallas_src>
import jax
import jax.numpy as jnp
import numpy as np
from jax.experimental import pallas as pl
from jax.experimental.pallas import tpu as pltpu

INPUT_DIM = 4
HIDDEN = 32          # Masked_SAB output dim (dim_V)
NUM_HEADS = 2
HEAD_DIM = HIDDEN // NUM_HEADS
OUT_DIM = 6

_ROW_TARGET = 2048   # target per-point rows per grid step (amortize ~0.35us/step)
_SUBLANE = 8
_LANE = 128


def _transformer_block_kernel(
    x_ref, mask_k_ref, mask_q_ref,
    w_in_ref, b_in_ref, w_tail_ref, b_tail_ref,
    out_ref,
):
    # x_ref: (TB, N, D); mask_k_ref: (TB, 1, N); mask_q_ref: (TB, N, 1)
    # out_ref: (TB, N, 6)
    tb, n, d = x_ref.shape
    f32 = jnp.float32

    x = x_ref[...].reshape(tb * n, d)                       # (TB*N, D), free (N % 8 == 0)

    # ---- fused input projection: [q | k/sqrt(dim_V) | v | conv1x1 proj] ----
    qkvp = jnp.dot(x, w_in_ref[...], preferred_element_type=f32) + b_in_ref[...]
    proj = qkvp[:, 3 * HIDDEN:3 * HIDDEN + OUT_DIM]         # (TB*N, 6), bias included

    # Stack the two heads along the leading (batch) axis so the whole masked
    # softmax and both attention einsums are emitted exactly once.
    def stack_heads(base):
        slabs = [
            qkvp[:, base + h * HEAD_DIM: base + (h + 1) * HEAD_DIM].reshape(tb, n, HEAD_DIM)
            for h in range(NUM_HEADS)
        ]
        return jnp.concatenate(slabs, axis=0)               # (H*TB, N, 16)

    qh = stack_heads(0)                                     # q (pre-bias applied in matmul)
    kh = stack_heads(HIDDEN)                                # k, already pre-scaled by 1/sqrt(32)
    vh = stack_heads(2 * HIDDEN)

    mask_k = jnp.concatenate([mask_k_ref[...]] * NUM_HEADS, axis=0)   # (H*TB, 1, N)

    att = jnp.einsum('bqd,bkd->bqk', qh, kh,
                     preferred_element_type=f32)            # (H*TB, N, N)
    att = jnp.where(mask_k == 0.0, f32(-1e9), att)          # exact reference masking
    att = att - jnp.max(att, axis=-1, keepdims=True)
    p = jnp.exp(att)
    p = p * pl.reciprocal(jnp.sum(p, axis=-1, keepdims=True), approx=True)

    oh = qh + jnp.einsum('bqk,bkd->bqd', p, vh,
                         preferred_element_type=f32)        # (H*TB, N, 16)

    # merge heads back onto the 32-wide feature axis (single lane concat)
    o = jnp.concatenate([oh[h * tb:(h + 1) * tb] for h in range(NUM_HEADS)], axis=-1)
    o = o.reshape(tb * n, HIDDEN)                           # (TB*N, 32), free

    # packed tail weights: [fc_o | (w1@w2)]
    wo = w_tail_ref[:, 0:HIDDEN]
    bo = b_tail_ref[:, 0:HIDDEN]
    w12 = w_tail_ref[:, HIDDEN:HIDDEN + OUT_DIM]
    b12 = b_tail_ref[:, HIDDEN:HIDDEN + OUT_DIM]

    # O = O + relu(fc_o(O))
    o = o + jnp.maximum(jnp.dot(o, wo, preferred_element_type=f32) + bo, 0.0)

    # dense (fused Linear(32,8)->Linear(8,6)) + conv1x1 projection residual
    dense = jnp.dot(o, w12, preferred_element_type=f32) + b12        # (TB*N, 6)

    out = (dense + proj).reshape(tb, n, OUT_DIM) * mask_q_ref[...]
    out_ref[...] = out


# ---------------------------------------------------------------------------
# block sizing (VMEM / megacore aware)
# ---------------------------------------------------------------------------

def _round_up(x, m):
    return ((x + m - 1) // m) * m


def _tile_bytes(rows, cols):
    # f32 bytes of a (rows, cols) slab after (8,128) sublane/lane padding
    return _round_up(max(rows, 1), _SUBLANE) * _round_up(max(cols, 1), _LANE) * 4


def _vmem_bytes_per_batch_elem(n):
    """Conservative (8,128)-padding-aware f32 footprint of one batch element."""
    h = NUM_HEADS
    # pipeline-managed blocks (double-buffered): x, key mask, point mask, out
    pipeline = 2 * (_tile_bytes(n, INPUT_DIM) + _tile_bytes(1, n)
                    + _tile_bytes(n, 1) + _tile_bytes(n, OUT_DIM))
    # compute temporaries (no buffer-reuse assumed)
    temps = (_tile_bytes(n, 3 * HIDDEN + OUT_DIM)     # qkvp
             + _tile_bytes(n, OUT_DIM)                # proj
             + 3 * h * _tile_bytes(n, HEAD_DIM)       # stacked q / k / v
             + h * _tile_bytes(1, n)                  # stacked key mask
             + 2 * h * _tile_bytes(n, n)              # att / softmax probs
             + h * _tile_bytes(n, HEAD_DIM)           # per-head attention output
             + 4 * _tile_bytes(n, HIDDEN))            # merged o, relu branch, dense, out
    return pipeline + temps


def _vmem_capacity_bytes():
    try:
        cap = int(pltpu.get_tpu_info().vmem_capacity_bytes)
        if cap > 0:
            return cap
    except Exception:
        pass
    return 64 * 1024 * 1024     # v7x per-TensorCore VMEM: safe lower bound


def _choose_block_b(B, n_pad, block_budget):
    """Batch elements per grid step: >= _ROW_TARGET rows, VMEM as the binding cap."""
    tb_rows = max(1, -(-_ROW_TARGET // n_pad))
    vmem_cap = max(1, block_budget // _vmem_bytes_per_batch_elem(n_pad))
    tb = min(tb_rows, vmem_cap, B)
    if B >= 2:
        tb = min(tb, -(-B // 2))    # >= 2 grid steps so both v7x TensorCores get work
    return max(1, tb)


# ---------------------------------------------------------------------------
# wrapper
# ---------------------------------------------------------------------------

def transformer_block(x, mask, params, *, block_b=None):
    """x: (B, N, D) f32, mask: (B, N). Returns (B, N, 6) f32."""
    B, N, D = x.shape
    x = x.astype(jnp.float32)
    mask = mask.astype(jnp.float32)

    # pad N to a sublane multiple so in-kernel reshapes are layout-free
    Np = _round_up(N, _SUBLANE)
    if Np != N:
        x = jnp.pad(x, ((0, 0), (0, Np - N), (0, 0)))
        mask = jnp.pad(mask, ((0, 0), (0, Np - N)))      # padded keys/queries masked out

    phys_vmem = _vmem_capacity_bytes()
    vmem_limit = min(int(phys_vmem * 0.8), 80 * 1024 * 1024)
    block_budget = min(int(phys_vmem * 0.4), 32 * 1024 * 1024)

    if block_b is None:
        block_b = _choose_block_b(B, Np, block_budget)
    block_b = max(1, min(block_b, B))

    num_blocks = -(-B // block_b)
    Bp = num_blocks * block_b
    if Bp != B:
        pad = Bp - B
        x = jnp.pad(x, ((0, pad), (0, 0), (0, 0)))
        mask = jnp.pad(mask, ((0, pad), (0, 0)))

    mask_k = mask.reshape(Bp, 1, Np)   # key mask (broadcast over queries)
    mask_q = mask.reshape(Bp, Np, 1)   # per-point output mask

    # ---- host-side weight fusion ----
    inv_scale = np.float32(1.0 / np.sqrt(HIDDEN))   # fold sqrt(dim_V) into k-path
    w_in = jnp.concatenate(
        [params["wq"], params["wk"] * inv_scale, params["wv"], params["wp"]],
        axis=1).astype(jnp.float32)                                  # (D, 102)
    b_in = jnp.concatenate(
        [params["bq"], params["bk"] * inv_scale, params["bv"], params["bp"]],
        axis=1).astype(jnp.float32)                                  # (1, 102)
    w12 = params["w1"] @ params["w2"]                                # (32, 6)
    b12 = params["b1"] @ params["w2"] + params["b2"]                 # (1, 6)
    w_tail = jnp.concatenate([params["wo"], w12], axis=1).astype(jnp.float32)  # (32, 38)
    b_tail = jnp.concatenate([params["bo"], b12], axis=1).astype(jnp.float32)  # (1, 38)

    out = pl.pallas_call(
        _transformer_block_kernel,
        out_shape=jax.ShapeDtypeStruct((Bp, Np, OUT_DIM), jnp.float32),
        grid=(num_blocks,),
        in_specs=[
            pl.BlockSpec((block_b, Np, D), lambda b: (b, 0, 0)),      # x
            pl.BlockSpec((block_b, 1, Np), lambda b: (b, 0, 0)),      # key mask
            pl.BlockSpec((block_b, Np, 1), lambda b: (b, 0, 0)),      # point mask
            # constant block index across the grid -> Pallas elides re-DMA of weights
            pl.BlockSpec(w_in.shape, lambda b: (0, 0)),
            pl.BlockSpec(b_in.shape, lambda b: (0, 0)),
            pl.BlockSpec(w_tail.shape, lambda b: (0, 0)),
            pl.BlockSpec(b_tail.shape, lambda b: (0, 0)),
        ],
        out_specs=pl.BlockSpec((block_b, Np, OUT_DIM), lambda b: (b, 0, 0)),
        compiler_params=pltpu.CompilerParams(
            dimension_semantics=("parallel",),
            vmem_limit_bytes=vmem_limit),
    )(x, mask_k, mask_q, w_in, b_in, w_tail, b_tail)

    return out[:B, :N]


# ---------------------------------------------------------------------------
# parameters / reference / demo
# ---------------------------------------------------------------------------

def init_params(key, input_dim):
    """Deterministic synthetic parameters (kernel-friendly (in, out) layout)."""
    ks = jax.random.split(key, 14)
    s = 0.2

    def w(k, shape):
        return (s * jax.random.normal(k, shape)).astype(jnp.float32)

    return {
        "wq": w(ks[0], (input_dim, HIDDEN)), "bq": w(ks[1], (1, HIDDEN)),
        "wk": w(ks[2], (input_dim, HIDDEN)), "bk": w(ks[3], (1, HIDDEN)),
        "wv": w(ks[4], (input_dim, HIDDEN)), "bv": w(ks[5], (1, HIDDEN)),
        "wo": w(ks[6], (HIDDEN, HIDDEN)),    "bo": w(ks[7], (1, HIDDEN)),
        "w1": w(ks[8], (HIDDEN, 8)),         "b1": w(ks[9], (1, 8)),
        "w2": w(ks[10], (8, OUT_DIM)),       "b2": w(ks[11], (1, OUT_DIM)),
        "wp": w(ks[12], (input_dim, OUT_DIM)), "bp": w(ks[13], (1, OUT_DIM)),
    }


def reference(x, mask, p):
    """Pure-JAX replica of the PyTorch forward for validation."""
    q = x @ p["wq"] + p["bq"]
    k = x @ p["wk"] + p["bk"]
    v = x @ p["wv"] + p["bv"]
    outs = []
    for h in range(NUM_HEADS):
        lo, hi = h * HEAD_DIM, (h + 1) * HEAD_DIM
        qh, kh, vh = q[..., lo:hi], k[..., lo:hi], v[..., lo:hi]
        att = jnp.einsum("bnd,bmd->bnm", qh, kh) / jnp.sqrt(jnp.float32(HIDDEN))
        att = jnp.where(mask[:, None, :] == 0.0, -1e9, att)
        a = jax.nn.softmax(att, axis=-1)
        outs.append(qh + jnp.einsum("bnm,bmd->bnd", a, vh))
    o = jnp.concatenate(outs, axis=-1)
    o = o + jax.nn.relu(o @ p["wo"] + p["bo"])
    d = (o @ p["w1"] + p["b1"]) @ p["w2"] + p["b2"]
    proj = x @ p["wp"] + p["bp"]
    return (d + proj) * mask[..., None]


if __name__ == "__main__":
    B, N, D = 2, 8, INPUT_DIM
    key = jax.random.PRNGKey(0)
    kx, km, kp = jax.random.split(key, 3)

    x = jax.random.normal(kx, (B, N, D), dtype=jnp.float32)
    mask = (jax.random.uniform(km, (B, N)) > 0.3).astype(jnp.float32)
    # guarantee at least one valid element per batch
    mask = mask.at[:, 0].set(1.0)

    params = init_params(kp, D)

    out = transformer_block(x, mask, params)
    out = jax.block_until_ready(out)

    ref = reference(x, mask, params)
    # tolerance loosened slightly for the EUP approximate reciprocal and the
    # host-side w1@w2 fusion (both sub-1e-3 effects).
    np.testing.assert_allclose(np.asarray(out), np.asarray(ref), rtol=1e-3, atol=1e-3)

    print("KERNEL_OK")
</pallas_src>

<mosaic_0001>
module attributes {stable_mosaic.version = 11 : i64} {
  func.func @_transformer_block_kernel(%arg0: i32, %arg1: memref<1x8x4xf32, #tpu.memory_space<vmem>>, %arg2: memref<1x1x8xf32, #tpu.memory_space<vmem>>, %arg3: memref<1x8x1xf32, #tpu.memory_space<vmem>>, %arg4: memref<4x102xf32, #tpu.memory_space<vmem>>, %arg5: memref<1x102xf32, #tpu.memory_space<vmem>>, %arg6: memref<32x38xf32, #tpu.memory_space<vmem>>, %arg7: memref<1x38xf32, #tpu.memory_space<vmem>>, %arg8: memref<1x8x6xf32, #tpu.memory_space<vmem>>) attributes {dimension_semantics = [#tpu.dimension_semantics<parallel>], iteration_bounds = array<i64: 2>, scalar_prefetch = 0 : i64, scratch_operands = 0 : i64, tpu.core_type = #tpu.core_type<tc>, window_params = [{transform_indices = @transform_0, window_bounds = array<i64: 1, 8, 4>}, {transform_indices = @transform_1, window_bounds = array<i64: 1, 1, 8>}, {transform_indices = @transform_2, window_bounds = array<i64: 1, 8, 1>}, {pipeline_mode = #tpu.pipeline_mode<synchronous>, transform_indices = @transform_3, window_bounds = array<i64: 4, 102>}, {pipeline_mode = #tpu.pipeline_mode<synchronous>, transform_indices = @transform_4, window_bounds = array<i64: 1, 102>}, {pipeline_mode = #tpu.pipeline_mode<synchronous>, transform_indices = @transform_5, window_bounds = array<i64: 32, 38>}, {pipeline_mode = #tpu.pipeline_mode<synchronous>, transform_indices = @transform_6, window_bounds = array<i64: 1, 38>}, {transform_indices = @transform_7, window_bounds = array<i64: 1, 8, 6>}]} {
    %c0 = arith.constant 0 : index
    %c0_0 = arith.constant 0 : index
    %c0_1 = arith.constant 0 : index
    %0 = vector.load %arg1[%c0, %c0_0, %c0_1] : memref<1x8x4xf32, #tpu.memory_space<vmem>>, vector<1x8x4xf32>
    %1 = vector.shape_cast %0 : vector<1x8x4xf32> to vector<8x4xf32>
    %c0_2 = arith.constant 0 : index
    %c0_3 = arith.constant 0 : index
    %2 = vector.load %arg4[%c0_2, %c0_3] : memref<4x102xf32, #tpu.memory_space<vmem>>, vector<4x102xf32>
    %cst = arith.constant dense<0.000000e+00> : vector<8x102xf32>
    %3 = tpu.matmul %1, %2, %cst {dimension_numbers = #tpu.dot_dimension_numbers<[1], [0], [0], [1], [0, 0, 1, 1], [], []>} : vector<8x4xf32>, vector<4x102xf32>, vector<8x102xf32> -> vector<8x102xf32>
    %c0_4 = arith.constant 0 : index
    %c0_5 = arith.constant 0 : index
    %4 = vector.load %arg5[%c0_4, %c0_5] : memref<1x102xf32, #tpu.memory_space<vmem>>, vector<1x102xf32>
    %5 = vector.broadcast %4 : vector<1x102xf32> to vector<8x102xf32>
    %6 = arith.addf %3, %5 : vector<8x102xf32>
    %7 = vector.extract_strided_slice %6 {offsets = [0, 96], sizes = [8, 6], strides = [1, 1]} : vector<8x102xf32> to vector<8x6xf32>
    %8 = vector.extract_strided_slice %6 {offsets = [0, 0], sizes = [8, 16], strides = [1, 1]} : vector<8x102xf32> to vector<8x16xf32>
    %9 = vector.shape_cast %8 : vector<8x16xf32> to vector<1x8x16xf32>
    %10 = vector.extract_strided_slice %6 {offsets = [0, 16], sizes = [8, 16], strides = [1, 1]} : vector<8x102xf32> to vector<8x16xf32>
    %11 = vector.shape_cast %10 : vector<8x16xf32> to vector<1x8x16xf32>
    %12 = tpu.concatenate %9, %11 in 0 : vector<1x8x16xf32>, vector<1x8x16xf32> -> vector<2x8x16xf32>
    %13 = vector.extract_strided_slice %6 {offsets = [0, 32], sizes = [8, 16], strides = [1, 1]} : vector<8x102xf32> to vector<8x16xf32>
    %14 = vector.shape_cast %13 : vector<8x16xf32> to vector<1x8x16xf32>
    %15 = vector.extract_strided_slice %6 {offsets = [0, 48], sizes = [8, 16], strides = [1, 1]} : vector<8x102xf32> to vector<8x16xf32>
    %16 = vector.shape_cast %15 : vector<8x16xf32> to vector<1x8x16xf32>
    %17 = tpu.concatenate %14, %16 in 0 : vector<1x8x16xf32>, vector<1x8x16xf32> -> vector<2x8x16xf32>
    %18 = vector.extract_strided_slice %6 {offsets = [0, 64], sizes = [8, 16], strides = [1, 1]} : vector<8x102xf32> to vector<8x16xf32>
    %19 = vector.shape_cast %18 : vector<8x16xf32> to vector<1x8x16xf32>
    %20 = vector.extract_strided_slice %6 {offsets = [0, 80], sizes = [8, 16], strides = [1, 1]} : vector<8x102xf32> to vector<8x16xf32>
    %21 = vector.shape_cast %20 : vector<8x16xf32> to vector<1x8x16xf32>
    %22 = tpu.concatenate %19, %21 in 0 : vector<1x8x16xf32>, vector<1x8x16xf32> -> vector<2x8x16xf32>
    %c0_6 = arith.constant 0 : index
    %c0_7 = arith.constant 0 : index
    %c0_8 = arith.constant 0 : index
    %23 = vector.load %arg2[%c0_6, %c0_7, %c0_8] : memref<1x1x8xf32, #tpu.memory_space<vmem>>, vector<1x1x8xf32>
    %24 = tpu.concatenate %23, %23 in 0 : vector<1x1x8xf32>, vector<1x1x8xf32> -> vector<2x1x8xf32>
    "tpu.trace_start"() <{level = 10 : i32, message = "bqd,bkd->bqk"}> : () -> ()
    %cst_9 = arith.constant dense<0.000000e+00> : vector<2x8x8xf32>
    %25 = tpu.matmul %12, %17, %cst_9 {dimension_numbers = #tpu.dot_dimension_numbers<[2], [2], [1], [1], [0, 0, 0, 1, 1, 1], [0], [0]>} : vector<2x8x16xf32>, vector<2x8x16xf32>, vector<2x8x8xf32> -> vector<2x8x8xf32>
    %cst_10 = arith.constant 0.000000e+00 : f32
    "tpu.trace_stop"() : () -> ()
    %26 = vector.broadcast %cst_10 : f32 to vector<2x1x8xf32>
    %27 = arith.cmpf oeq, %24, %26 : vector<2x1x8xf32>
    %cst_11 = arith.constant -1.000000e+09 : f32
    %28 = vector.shape_cast %27 : vector<2x1x8xi1> to vector<2x1x8xi1>
    %29 = vector.broadcast %28 : vector<2x1x8xi1> to vector<2x8x8xi1>
    %30 = vector.broadcast %cst_11 : f32 to vector<2x8x8xf32>
    %31 = arith.select %29, %30, %25 : vector<2x8x8xi1>, vector<2x8x8xf32>
    %cst_12 = arith.constant dense<0xFF800000> : vector<2x8xf32>
    %32 = vector.multi_reduction <maximumf>, %31, %cst_12 [2] : vector<2x8x8xf32> to vector<2x8xf32>
    %33 = vector.shape_cast %32 : vector<2x8xf32> to vector<2x8x1xf32>
    %34 = vector.broadcast %33 : vector<2x8x1xf32> to vector<2x8x8xf32>
    %35 = arith.subf %31, %34 : vector<2x8x8xf32>
    %36 = math.exp %35 : vector<2x8x8xf32>
    %cst_13 = arith.constant dense<0.000000e+00> : vector<2x8xf32>
    %37 = vector.multi_reduction <add>, %36, %cst_13 [2] : vector<2x8x8xf32> to vector<2x8xf32>
    %38 = vector.shape_cast %37 : vector<2x8xf32> to vector<2x8x1xf32>
    %39 = tpu.reciprocal %38 {approx = true} : vector<2x8x1xf32> -> vector<2x8x1xf32>
    %40 = vector.broadcast %39 : vector<2x8x1xf32> to vector<2x8x8xf32>
    %41 = arith.mulf %36, %40 : vector<2x8x8xf32>
    "tpu.trace_start"() <{level = 10 : i32, message = "bqk,bkd->bqd"}> : () -> ()
    %cst_14 = arith.constant dense<0.000000e+00> : vector<2x8x16xf32>
    %42 = tpu.matmul %41, %22, %cst_14 {dimension_numbers = #tpu.dot_dimension_numbers<[2], [1], [1], [2], [0, 0, 0, 1, 1, 2], [0], [0]>} : vector<2x8x8xf32>, vector<2x8x16xf32>, vector<2x8x16xf32> -> vector<2x8x16xf32>
    "tpu.trace_stop"() : () -> ()
    %43 = arith.addf %12, %42 : vector<2x8x16xf32>
    %44 = vector.extract_strided_slice %43 {offsets = [0, 0, 0], sizes = [1, 8, 16], strides = [1, 1, 1]} : vector<2x8x16xf32> to vector<1x8x16xf32>
    %45 = vector.extract_strided_slice %43 {offsets = [1, 0, 0], sizes = [1, 8, 16], strides = [1, 1, 1]} : vector<2x8x16xf32> to vector<1x8x16xf32>
    %46 = tpu.concatenate %44, %45 in 2 : vector<1x8x16xf32>, vector<1x8x16xf32> -> vector<1x8x32xf32>
    %47 = vector.shape_cast %46 : vector<1x8x32xf32> to vector<8x32xf32>
    %c0_15 = arith.constant 0 : index
    %c0_16 = arith.constant 0 : index
    %48 = vector.load %arg6[%c0_15, %c0_16] : memref<32x38xf32, #tpu.memory_space<vmem>>, vector<32x32xf32>
    %c0_17 = arith.constant 0 : index
    %c0_18 = arith.constant 0 : index
    %49 = vector.load %arg7[%c0_17, %c0_18] : memref<1x38xf32, #tpu.memory_space<vmem>>, vector<1x32xf32>
    %c0_19 = arith.constant 0 : index
    %c32 = arith.constant 32 : index
    %50 = vector.load %arg6[%c0_19, %c32] : memref<32x38xf32, #tpu.memory_space<vmem>>, vector<32x6xf32>
    %c0_20 = arith.constant 0 : index
    %c32_21 = arith.constant 32 : index
    %51 = vector.load %arg7[%c0_20, %c32_21] : memref<1x38xf32, #tpu.memory_space<vmem>>, vector<1x6xf32>
    %cst_22 = arith.constant dense<0.000000e+00> : vector<8x32xf32>
    %52 = tpu.matmul %47, %48, %cst_22 {dimension_numbers = #tpu.dot_dimension_numbers<[1], [0], [0], [1], [0, 0, 1, 1], [], []>} : vector<8x32xf32>, vector<32x32xf32>, vector<8x32xf32> -> vector<8x32xf32>
    %53 = vector.broadcast %49 : vector<1x32xf32> to vector<8x32xf32>
    %54 = arith.addf %52, %53 : vector<8x32xf32>
    %cst_23 = arith.constant 0.000000e+00 : f32
    %55 = vector.broadcast %cst_23 : f32 to vector<8x32xf32>
    %56 = arith.maximumf %54, %55 : vector<8x32xf32>
    %57 = arith.addf %47, %56 : vector<8x32xf32>
    %cst_24 = arith.constant dense<0.000000e+00> : vector<8x6xf32>
    %58 = tpu.matmul %57, %50, %cst_24 {dimension_numbers = #tpu.dot_dimension_numbers<[1], [0], [0], [1], [0, 0, 1, 1], [], []>} : vector<8x32xf32>, vector<32x6xf32>, vector<8x6xf32> -> vector<8x6xf32>
    %59 = vector.broadcast %51 : vector<1x6xf32> to vector<8x6xf32>
    %60 = arith.addf %58, %59 : vector<8x6xf32>
    %61 = arith.addf %60, %7 : vector<8x6xf32>
    %62 = vector.shape_cast %61 : vector<8x6xf32> to vector<1x8x6xf32>
    %c0_25 = arith.constant 0 : index
    %c0_26 = arith.constant 0 : index
    %c0_27 = arith.constant 0 : index
    %63 = vector.load %arg3[%c0_25, %c0_26, %c0_27] : memref<1x8x1xf32, #tpu.memory_space<vmem>>, vector<1x8x1xf32>
    %64 = vector.broadcast %63 : vector<1x8x1xf32> to vector<1x8x6xf32>
    %65 = arith.mulf %62, %64 : vector<1x8x6xf32>
    %c0_28 = arith.constant 0 : index
    %c0_29 = arith.constant 0 : index
    %c0_30 = arith.constant 0 : index
    %66 = vector.load %arg8[%c0_28, %c0_29, %c0_30] : memref<1x8x6xf32, #tpu.memory_space<vmem>>, vector<1x8x6xf32>
    tpu.vector_store %arg8[%c0_28, %c0_29, %c0_30], %65 {strides = array<i32>} : memref<1x8x6xf32, #tpu.memory_space<vmem>>, vector<1x8x6xf32>,
    return
  }
  func.func @transform_0(%arg0: i32) -> (i32, i32, i32) {
    %c0_i32 = arith.constant 0 : i32
    %c0_i32_0 = arith.constant 0 : i32
    %c0_i32_1 = arith.constant 0 : i32
    return %arg0, %c0_i32, %c0_i32_0 : i32, i32, i32
  }
  func.func @transform_1(%arg0: i32) -> (i32, i32, i32) {
    %c0_i32 = arith.constant 0 : i32
    %c0_i32_0 = arith.constant 0 : i32
    %c0_i32_1 = arith.constant 0 : i32
    return %arg0, %c0_i32, %c0_i32_0 : i32, i32, i32
  }
  func.func @transform_2(%arg0: i32) -> (i32, i32, i32) {
    %c0_i32 = arith.constant 0 : i32
    %c0_i32_0 = arith.constant 0 : i32
    %c0_i32_1 = arith.constant 0 : i32
    return %arg0, %c0_i32, %c0_i32_0 : i32, i32, i32
  }
  func.func @transform_3(%arg0: i32) -> (i32, i32) {
    %c0_i32 = arith.constant 0 : i32
    %c0_i32_0 = arith.constant 0 : i32
    %c0_i32_1 = arith.constant 0 : i32
    return %c0_i32, %c0_i32_0 : i32, i32
  }
  func.func @transform_4(%arg0: i32) -> (i32, i32) {
    %c0_i32 = arith.constant 0 : i32
    %c0_i32_0 = arith.constant 0 : i32
    %c0_i32_1 = arith.constant 0 : i32
    return %c0_i32, %c0_i32_0 : i32, i32
  }
  func.func @transform_5(%arg0: i32) -> (i32, i32) {
    %c0_i32 = arith.constant 0 : i32
    %c0_i32_0 = arith.constant 0 : i32
    %c0_i32_1 = arith.constant 0 : i32
    return %c0_i32, %c0_i32_0 : i32, i32
  }
  func.func @transform_6(%arg0: i32) -> (i32, i32) {
    %c0_i32 = arith.constant 0 : i32
    %c0_i32_0 = arith.constant 0 : i32
    %c0_i32_1 = arith.constant 0 : i32
    return %c0_i32, %c0_i32_0 : i32, i32
  }
  func.func @transform_7(%arg0: i32) -> (i32, i32, i32) {
    %c0_i32 = arith.constant 0 : i32
    %c0_i32_0 = arith.constant 0 : i32
    %c0_i32_1 = arith.constant 0 : i32
    return %arg0, %c0_i32, %c0_i32_0 : i32, i32, i32
  }
}

</mosaic_0001>

<bundles_post_ra>
// kernel: tpu_custom_call.1
= control target key start
LH: loop header
LB: loop body
LE: loop exit
PB: predicated region body
PF: predicated region fallthrough
CT: control target
= control target key end

     0   :  { %s1201_s24 = smov 0   ;;  %s1305_s0 = inlined_call_operand.vmem [shape: f32[2,8,4], index: 0, kind: input, shape index: {}]   ;;  %s1306_s1 = inlined_call_operand.vmem [shape: f32[2,1,8], index: 1, kind: input, shape index: {}]   ;;  %s1307_s2 = inlined_call_operand.vmem [shape: f32[2,8,1], index: 2, kind: input, shape index: {}]   ;;  %s1308_s3 = inlined_call_operand.vmem [shape: f32[4,102], index: 3, kind: input, shape index: {}]   ;;  %s1309_s4 = inlined_call_operand.vmem [shape: f32[1,102], index: 4, kind: input, shape index: {}]   ;;  %s1310_s5 = inlined_call_operand.vmem [shape: f32[32,38], index: 5, kind: input, shape index: {}]   ;;  %s1311_s6 = inlined_call_operand.vmem [shape: f32[1,38], index: 6, kind: input, shape index: {}]   ;;  %s1312_s7 = inlined_call_operand.vmem [shape: f32[2,8,6], index: 7, kind: output, shape index: {}]  }
   0x1 LB: > { %s1007_s25 = sadd.s32 4294967295, %s1150_s24   ;;  %p1011_p0 = scmp.ge.s32.totalorder %s1150_s24, 1  ;;  %s1150_s24 = sphi %s1201_s24, %s17_s24  }
   0x2   : > { %p253_p1 = scmp.lt.s32.totalorder %s1150_s24, 3 }
   0x4   : > { %p254_p2 = pnand %p1011_p0, %p253_p1 }
   0x5   : > { %v306_v0 = vld [vmem:[%s1308_s3] sm:$0xf] (!%p254_p2)  ;;  %vm318_vm0 = vcmask (!%p254_p2), 1043456   ;;  %p290_p3 = scmp.lt.s32.totalorder (!%p254_p2), %s1007_s25, 1  ;;  %v1152_v1 = vmov (!%p254_p2), 0.0   ;;  %vm1153_vm1 = vmmov (!%p254_p2), 0   ;;  %v552_v11 = vlaneseq (!%p254_p2) }
   0x6   : > { %257 = sbr.rel (%p254_p2) target bundleno = 1758 (0x6de), region = 48  ;;  %1049 = vmatprep.subr.mxu0 (!%p254_p2), %v1152_v1  ;;  %1051 = vmatprep.mubr.msk.f32.mxu0 (!%p254_p2), %vm1153_vm1, %v1152_v1  ;;  %vm314_vm2 = vcmask (!%p254_p2), 31744   ;;  %v1015_v3 = vld [vmem:[%s1309_s4] ss:$0 sm:$0xff] (!%p254_p2)  ;;  %s1154_s11 = smov (!%p254_p2), 96   ;;  %vm399_vm3 = vcmask (!%p254_p2), 130048  }
   0x7   : > { %1050 = vmatpush3.msk.msra.mxu0 (!%p254_p2), %vm318_vm0, %v306_v0  ;;  %1054 = vmatprep.subr.mxu1 (!%p254_p2), %v1152_v1  ;;  %s1155_s12 = smov (!%p254_p2), 112   ;;  %v1156_v9 = vmov (!%p254_p2), 0   ;;  %v553_v13 = vshrl.u32 (!%p254_p2), %v552_v11, 7  ;;  %vm559_vm6 = vcmask (!%p254_p2), 64512   ;;  %s1157_s16 = smov (!%p254_p2), 64   ;;  %v741_v43 = vld [vmem:[%s1310_s5] sm:$0xff] (!%p254_p2) }
   0x8   : > { %1056 = vmatprep.mubr.msk.f32.mxu1 (!%p254_p2), %vm1153_vm1, %v1152_v1  ;;  %1059 = vmatprep.subr.mxu0 (!%p254_p2), %v1152_v1  ;;  %v742_v44 = vld [vmem:[%s1310_s5 + $0x8] sm:$0xff] (!%p254_p2)  ;;  %v743_v46 = vld [vmem:[%s1310_s5 + $0x10] sm:$0xff] (!%p254_p2)  ;;  %v744_v47 = vld [vmem:[%s1310_s5 + $0x18] sm:$0xff] (!%p254_p2)  ;;  %v1158_v50 = vmov (!%p254_p2), 0.0|0.0   ;;  %s1159_s26 = smov (!%p254_p2), 16   ;;  %s1160_s30 = smov (!%p254_p2), 32  }
   0x9   : > { %1135 = vset.pattern.permute.xlu0 (!%p254_p2), %v1156_v9  ;;  %v554_v14 = vsub.s32 (!%p254_p2), 0, %v553_v13  ;;  %v1125_v45 = vpack.i.bf16 (!%p254_p2), %v742_v44, %v741_v43  ;;  %v1130_v48 = vpack.i.bf16 (!%p254_p2), %v744_v47, %v743_v46  ;;  %v1097_v49 = vpack.c.bf16 (!%p254_p2), %v742_v44, %v741_v43  ;;  %v1024_v57 = vld [vmem:[%s1311_s6] ss:$0 sm:$0xff] (!%p254_p2) }
   0xa   : > { %v1100_v51 = vpack.c.bf16 (!%p254_p2), %v744_v47, %v743_v46  ;;  %vm752_vm7 = vcmask (!%p254_p2), 261120   ;;  %vm931_vm8 = vcmask (!%p254_p2), 48128  }
   0xd   : > { %s1314_s25 = smov (!%p290_p3, %s1007_s25), 1 }
   0xe   : > { %s1222_s28 = sshll.u32 %s1314_s25, 3  ;;  %s296_s15 = scalar_lea.vmem %s1306_s1, %s1314_s25 }
   0xf   : > { %s293_s8 = scalar_lea.vmem %s1305_s0, %s1222_s28  ;;  %v396_v12 = vld [vmem:[%s296_s15] sm:$0x1]  ;;  %s300_s10 = scalar_lea.vmem %s1307_s2, %s1222_s28 }
  0x10   : > { %v305_v2 = vld [vmem:[%s293_s8] sm:$0xff]  ;;  %vm550_vm4 = vcmp.eq.f32.partialorder %v396_v12, 0.0  ;;  %s304_s13 = scalar_lea.vmem %s1312_s7, %s1222_s28 }
  0x11   : > { %1052 = vmatmul.mubr.msk.f32.vlgmr.msra.gmra.mrb[0].mxu0 %vm314_vm2, %v305_v2  ;;  %v551_v15 = vsel %vm550_vm4, 1, %v1156_v9 }
  0x12   : > { %1061 = vmatprep.mubr.msk.f32.mxu0 %vm1153_vm1, %v1152_v1  ;;  %v555_v16 = vrot.slane %v551_v15, %v554_v14 }
  0x14   : > { %vm556_vm5 = vcmp.eq.s32.totalorder %v555_v16, 1 }
  0xe4   : > { %v388_v4 = vpop.f32.mrb[0].mxu0 }
  0xe5   : > { %v1233_v5 = vadd.f32 %v1015_v3, %v388_v4  ;;  %v1053_v6 = vpop.f32.mrb[1].mxu0 }
  0xe7   : > { %397 = vrot.lane.b32.xlu1 %v1233_v5, %s1154_s11  ;;  %393 = vrot.lane.b32.xlu0 %v1233_v5, %s1155_s12 }
 0x159   : > { %v398_v7 = vpop.permute.xlu1 %397  ;;  %v1238_v8 = vpop.permute.xlu0 %393 }
 0x15a   : > { %1055 = vmatpush3.xpose.msk.msra.mxu1 %vm399_vm3, %v398_v7  ;;  %474 = vrot.lane.b32.xlu0 %v1238_v8, %s1154_s11 }
 0x15b   : > { %1064 = vmatprep.subr.mxu1 %v1152_v1 }
 0x15d   : > { %1057 = vmatmul.mubr.msk.f32.vlgmr.msra.gmra.mrb[0].mxu1 %vm399_vm3, %v1233_v5 }
 0x15e   : > { %1066 = vmatprep.mubr.msk.f32.mxu1 %vm1153_vm1, %v1152_v1 }
 0x1cc   : > { %v475_v10 = vpop.permute.xlu0 %474 }
 0x1cd   : > { %1060 = vmatpush3.xpose.msk.msra.mxu0 %vm399_vm3, %v475_v10 }
 0x1ce   : > { %1069 = vmatprep.subr.mxu0 %v1152_v1 }
 0x1d0   : > { %1062 = vmatmul.mubr.msk.f32.vlgmr.msra.gmra.mrb[2].mxu0 %vm399_vm3, %v1238_v8 }
 0x1d1   : > { %1071 = vmatprep.mubr.msk.f32.mxu0 %vm1153_vm1, %v1152_v1 }
 0x230   : > { %v470_v17 = vpop.f32.mrb[0].mxu1 }
 0x231   : > { %v557_v18 = vsel %vm556_vm5, -1e+09, %v470_v17  ;;  %v1058_v19 = vpop.f32.mrb[1].mxu1 }
 0x232   : > { %v560_v20 = vsel %vm559_vm6, %v557_v18, -inf }
 0x233   : > { %561 = vmax.xlane.f32.xlu0 %v560_v20 }
 0x2a3   : > { %v546_v21 = vpop.f32.mrb[2].mxu0 }
 0x2a4   : > { %v558_v22 = vsel %vm556_vm5, -1e+09, %v546_v21  ;;  %v1063_v23 = vpop.f32.mrb[3].mxu0 }
 0x2a5   : > { %v563_v24 = vsel %vm559_vm6, %v558_v22, -inf }
 0x2a6   : > { %564 = vmax.xlane.f32.xlu1 %v563_v24 }
 0x2b7   : > { %658 = vrot.lane.b32.xlu1 %v1238_v8, %s1157_s16 }
 0x2c0   : > { %v562_v25 = vpop.xlane.xlu0 %561 }
 0x2c1   : > { %v566_v26 = vsub.f32 %v557_v18, %v562_v25 }
 0x2c3   : > { %v568_v29 = vmul.f32 1.442695, %v566_v26 }
 0x333   : > { %v565_v27 = vpop.xlane.xlu1 %564 }
 0x334   : > { %v567_v28 = vsub.f32 %v558_v22, %v565_v27 }
 0x336   : > { %v570_v30 = vmul.f32 1.442695, %v567_v28 }
 0x337   : > { %v659_v31 = vpop.permute.xlu1 %658 }
 0x338   : > { %1136 = vpow2.f32 %v570_v30  ;;  %1070 = vmatpush3.msra.mxu0 %v659_v31 }
 0x339   : > { %1138 = vpow2.f32 %v568_v29  ;;  %1102 = vmatprep.subr.bf16.mxu0 %v1158_v50 }
 0x342   : > { %v1137_v32 = vpop.eup %1136 }
 0x343   : > { %v575_v33 = vsel %vm559_vm6, %v1137_v32, 0.0  ;;  %v1139_v34 = vpop.eup %1138 }
 0x344   : > { %576 = vadd.xlane.f32.xlu0 %v575_v33  ;;  %v572_v35 = vsel %vm559_vm6, %v1139_v34, 0.0 }
 0x348   : > { %573 = vadd.xlane.f32.xlu0 %v572_v35 }
 0x35e   : > { %582 = vrot.lane.b32.xlu0 %v1233_v5, %s1157_s16 }
 0x3d1   : > { %v577_v36 = vpop.xlane.xlu0 %576 }
 0x3d2   : > { %1140 = vrcp.f32 %v577_v36 }
 0x3d5   : > { %v574_v37 = vpop.xlane.xlu0 %573 }
 0x3d6   : > { %1142 = vrcp.f32 %v574_v37 }
 0x3d9   : > { %v583_v38 = vpop.permute.xlu0 %582 }
 0x3da   : > { %1065 = vmatpush3.msra.mxu1 %v583_v38 }
 0x3db   : > { %1096 = vmatprep.subr.bf16.mxu1 %v1158_v50 }
 0x3dc   : > { %v1141_v39 = vpop.eup %1140 }
 0x3dd   : > { %v581_v40 = vmul.f32 %v1141_v39, %v1137_v32 }
 0x3df   : > { %1072 = vmatmul.mubr.msk.f32.vlgmr.msra.gmra.mrb[4].mxu0 %vm559_vm6, %v581_v40 }
 0x3e0   : > { %v1143_v41 = vpop.eup %1142  ;;  %1093 = vmatprep.mubr.msk.f32.mxu0 %vm1153_vm1, %v1152_v1 }
 0x3e1   : > { %v580_v42 = vmul.f32 %v1143_v41, %v1139_v34 }
 0x3e3   : > { %1067 = vmatmul.mubr.msk.f32.vlgmr.msra.gmra.mrb[2].mxu1 %vm559_vm6, %v580_v42 }
 0x3e4   : > { %1082 = vmatprep.mubr.msk.f32.mxu1 %vm1153_vm1, %v1152_v1  ;;  %1098 = vmatpush3.bf16.msra.mxu1 %v1097_v49 }
 0x3e5   : > { %1099 = vmatprep.subr.bf16.mxu1 %v1158_v50 }
 0x3e8   : > { %1101 = vmatpush3.bf16.msra.mxu1 %v1100_v51 }
 0x4b2   : > { %v730_v52 = vpop.f32.mrb[4].mxu0 }
 0x4b3   : > { %v735_v53 = vadd.f32 %v730_v52, %v1238_v8  ;;  %v1073_v54 = vpop.f32.mrb[5].mxu0 }
 0x4b5   : > { %737 = vrot.lane.b32.xlu1 %v735_v53, %s1159_s26 }
 0x4b6   : > { %v654_v55 = vpop.f32.mrb[2].mxu1 }
 0x4b7   : > { %v1068_v56 = vpop.f32.mrb[3].mxu1  ;;  %v734_v58 = vadd.f32 %v654_v55, %v1233_v5 }
 0x4b9   : > { %1126 = vrot.lane.b32.xlu1 %v1125_v45, %s1154_s11 }
 0x4bd   : > { %1131 = vrot.lane.b32.xlu1 %v1130_v48, %s1154_s11 }
 0x4c1   : > { %844 = vrot.lane.b32.xlu1 %v1024_v57, %s1154_s11 }
 0x4c5   : > { %920 = vrot.lane.b32.xlu1 %v1233_v5, %s1160_s30  ;;  %v924_v5 = vld [vmem:[%s300_s10] sm:$0xff] }
 0x4c6   : > { %927 = vperm.xlu0 %1135, %v924_v5  }
 0x527   : > { %v738_v59 = vpop.permute.xlu1 %737 }
 0x528   : > { %v740_v60 = vsel %vm399_vm3, %v734_v58, %v738_v59 }
 0x529   : > { %1083 = vmatmul.mubr.msk.f32.vlgmr.msra.gmra.mrb[4].mxu1 %vm752_vm7, %v740_v60 }
 0x52b   : > { %v1127_v61 = vpop.permute.xlu1 %1126 }
 0x52c   : > { %v1129_v62 = vunpack.i.h.bf16 %v1127_v61  ;;  %v1128_v63 = vunpack.i.l.bf16 %v1127_v61 }
 0x52e   : > { %v1103_v0 = vpack.c.bf16 %v1129_v62, %v1128_v63 }
 0x52f   : > { %v1132_v1 = vpop.permute.xlu1 %1131 }
 0x530   : > { %v1134_v2 = vunpack.i.h.bf16 %v1132_v1  ;;  %v1133_v3 = vunpack.i.l.bf16 %v1132_v1  ;;  %1104 = vmatpush3.bf16.msra.mxu0 %v1103_v0 }
 0x531   : > { %1105 = vmatprep.subr.bf16.mxu0 %v1158_v50 }
 0x532   : > { %v1106_v4 = vpack.c.bf16 %v1134_v2, %v1133_v3 }
 0x533   : > { %v845_v11 = vpop.permute.xlu1 %844 }
 0x534   : > { %1107 = vmatpush3.bf16.msra.mxu0 %v1106_v4 }
 0x537   : > { %v921_v15 = vpop.permute.xlu1 %920 }
 0x545   : > { %v928_v16 = vpop.permute.xlu0 %927 }
 0x5fc   : > { %v822_v6 = vpop.f32.mrb[4].mxu1 }
 0x5fd   : > { %v823_v7 = vadd.f32 %v1024_v57, %v822_v6  ;;  %v1084_v8 = vpop.f32.mrb[5].mxu1 }
 0x5ff   : > { %v826_v9 = vmax.f32 %v823_v7, 0.0 }
 0x601   : > { %v827_v10 = vadd.f32 %v826_v9, %v740_v60 }
 0x603   : > { %1094 = vmatmul.mubr.msk.f32.vlgmr.msra.gmra.mrb[6].mxu0 %vm752_vm7, %v827_v10 }
 0x6d6   : > { %v916_v12 = vpop.f32.mrb[6].mxu0 }
 0x6d7   : > { %v917_v13 = vadd.f32 %v916_v12, %v845_v11  ;;  %v1095_v14 = vpop.f32.mrb[7].mxu0 }
 0x6d9   : > { %v923_v17 = vadd.f32 %v921_v15, %v917_v13 }
 0x6db   : > { %v930_v18 = vmul.f32 %v928_v16, %v923_v17 }
 0x6dd   : > { %932 = vst.msk [vmem:[%s304_s13] sm:$0xff] %vm931_vm8, %v930_v18 }
 0x6de PF: > { %s17_s24 = sadd.s32 1, %s1150_s24  }
 0x6df   : > { %p14_p4 = scmp.ge.s32.totalorder %s17_s24, 4  }
 0x6e1   :  { %16 = sbr.rel (!%p14_p4) target bundleno = 1 (0x1), region = 84 }

</bundles_post_ra>
